<compile_context>
chip_gen: v7x
topology: tpu7x:2x2x1
jax: 0.10.0
libtpu: 0.0.40
codegen_flags: <defaults>
</compile_context>

<pallas_src>
import functools

import numpy as np

import jax
import jax.numpy as jnp
from jax.experimental import pallas as pl
from jax.experimental.pallas import tpu as pltpu

_LANE = 128
_SUB = 8


def _round_up(n, m):
    return ((n + m - 1) // m) * m


def _cdiv(a, b):
    return (a + b - 1) // b


def _vmem_budget_bytes():
    """Returns (budget, capacity).  Budget ~55% of physical VMEM; falls back to a
    64 MiB capacity (the v7x per-core floor) if the query is unavailable."""
    cap = 64 << 20
    try:
        cap = int(pltpu.get_tpu_info().vmem_capacity_bytes)
    except Exception:
        pass
    return int(0.55 * cap), cap


def _pick_tiles(B, F_pad, C, x_isz, mxu_isz, out_isz, budget):
    """Pick (tb, tn, n_ct, c_aug, need_bytes).

    Preference: the largest batch tile first (MXU M dim — the weight term does
    not shrink with tb, so shrinking tb never helps VMEM), then the fewest
    class tiles.  The VMEM estimate includes in-kernel temporaries.
    """
    b8 = _round_up(B, _SUB)
    tb_cap = min(512, b8)
    if B > 64:
        # Keep >= ~4 batch tiles so v7x's two TensorCores both get work and the
        # x DMA can overlap compute on every generation.
        tb_cap = min(tb_cap, max(_SUB, _round_up(_cdiv(B, 4), _SUB)))
    tb_cands = [t for t in (512, 256, 128, 64, 32, 16, 8) if t <= tb_cap] or [_SUB]

    tn_full = _round_up(C + 1, _LANE)          # +1 padding row holds the g weight row
    tn_cands = [tn_full] + [t for t in (1024, 512, 256, 128) if t < tn_full]

    def need_bytes(tb, tn, n_ct):
        w_bufs = 1 if n_ct == 1 else 2         # resident weights -> single buffer
        return (2 * tb * F_pad * x_isz                  # x tile, double-buffered
                + w_bufs * tn * F_pad * mxu_isz         # weight tile(s)
                + tb * F_pad * (4 + mxu_isz)            # in-kernel x upcast + MXU cast
                + 3 * tb * tn * 4                       # raw / num / quot f32 temporaries
                + 2 * 2 * tb * tn * out_isz             # quot + num out tiles, double-buffered
                + 2 * tb * _LANE * 4                    # den out tiles (lane-padded in VMEM)
                + 2 * tb * _LANE * 4)                   # exp(-pre) / 1/||x|| scratch (lane-padded)

    best = None
    for tb in tb_cands:
        for tn in tn_cands:
            c_aug = _round_up(C + 1, tn)
            n_ct = c_aug // tn
            nb = need_bytes(tb, tn, n_ct)
            if nb <= budget:
                return tb, tn, n_ct, c_aug, nb
            if best is None or nb < best[4]:
                best = (tb, tn, n_ct, c_aug, nb)
    return best                                # nothing fits: smallest footprint


def _pad2(a, rows, cols):
    pr, pc = rows - a.shape[0], cols - a.shape[1]
    if pr == 0 and pc == 0:
        return a
    return jnp.pad(a, ((0, pr), (0, pc)))


def _make_godin_kernel(g_col, mxu_dtype):
    """g_col: local column (within the first-processed class tile) holding the
    folded g-branch row."""

    def kernel(x_ref, w_ref, gshift_ref, quot_ref, num_ref, den_ref, e_sc, inv_sc):
        j = pl.program_id(1)
        x = x_ref[...]                                   # native dtype (f32 or bf16)

        # raw = x @ w_tile^T : contract over features, no transpose materialized.
        raw = jax.lax.dot_general(
            x.astype(mxu_dtype), w_ref[...],
            dimension_numbers=(((1,), (1,)), ((), ())),
            preferred_element_type=jnp.float32)          # (tb, tn) f32

        # The class tile processed at j == 0 contains the folded g row: compute the
        # per-row statistics once per batch tile and stash them in scratch.
        @pl.when(j == 0)
        def _():
            xf = x.astype(jnp.float32)
            x_norm = jnp.sqrt(jnp.sum(xf * xf, axis=1, keepdims=True))      # (tb, 1)
            inv_sc[...] = pl.reciprocal(x_norm + 1e-4, approx=False)
            # g branch pre-activation = static column g_col of the matmul + BN shift.
            pre = raw[:, g_col:g_col + 1] + gshift_ref[0, 0]                # (tb, 1)
            e = jnp.exp(-pre)                                               # EUP
            e_sc[...] = e
            # denominators = sigmoid(pre) = 1 / (1 + exp(-pre))
            den_ref[...] = pl.reciprocal(1.0 + e, approx=False).astype(den_ref.dtype)

        # x-normalization applied after the matmul (mathematically identical).
        num = raw * inv_sc[...]                          # (tb, tn)
        # quotients = num / sigmoid(pre) = num * (1 + exp(-pre))  (no extra reciprocal)
        quot = num * (1.0 + e_sc[...])
        num_ref[...] = num.astype(num_ref.dtype)
        quot_ref[...] = quot.astype(quot_ref.dtype)

    return kernel


@functools.partial(jax.jit, static_argnames=("bn_eps", "mxu_dtype", "out_dtype"))
def godin_forward(x, h_w, g_w, g_b, bn_gamma, bn_beta, bn_mean, bn_var,
                  bn_eps=1e-5, mxu_dtype=jnp.bfloat16, out_dtype=None):
    """Eval-mode GodinLayer forward. Returns (quotients, numerators, denominators)."""
    B, F = x.shape
    C, _ = h_w.shape
    out_dtype = np.dtype(x.dtype if out_dtype is None else out_dtype)
    mxu_dtype = np.dtype(mxu_dtype)
    F_pad = _round_up(F, _LANE)

    # ---- one-time, x-independent preprocessing (plain XLA glue) ----
    # Fold Linear bias + eval-mode BatchNorm1d(1): BN(x@gw.T + b) = x@(gw*s).T + shift.
    inv_std = 1.0 / jnp.sqrt(bn_var.astype(jnp.float32) + bn_eps)
    s = bn_gamma.astype(jnp.float32) * inv_std                              # (1,)
    g_shift = ((g_b.astype(jnp.float32) - bn_mean.astype(jnp.float32)) * s
               + bn_beta.astype(jnp.float32)).reshape(1, 1)                 # SMEM scalar
    gw_scaled = (g_w.astype(jnp.float32) * s).reshape(1, F)                 # (1, F)

    # Normalize the class weights once (hoisted out of the per-tile body) and
    # append the BN-scaled g row so its dot product rides the same MXU matmul.
    h_w32 = h_w.astype(jnp.float32)
    w_norm = jnp.sqrt(jnp.sum(h_w32 * h_w32, axis=1, keepdims=True))
    wn = h_w32 / (w_norm + 1e-4)
    w_aug = jnp.concatenate([wn, gw_scaled], axis=0)                        # (C+1, F), row C = g

    # ---- tiling / padding ----
    budget, cap = _vmem_budget_bytes()
    tb, tn, n_ct, c_aug, need = _pick_tiles(
        B, F_pad, C, x.dtype.itemsize, mxu_dtype.itemsize, out_dtype.itemsize, budget)
    b_pad = _round_up(B, tb)
    n_bt = b_pad // tb
    g_local = C % tn                          # g row sits in the last class tile

    x_p = _pad2(x, b_pad, F_pad)                                # native dtype (bf16 x halves DMA)
    w_p = _pad2(w_aug, c_aug, F_pad).astype(mxu_dtype)          # bf16 MXU operand

    # Process the g-holding class tile first so scratch stats exist before the
    # remaining class tiles use them.  perm(0) = n_ct-1 (the g tile), perm(j) = j-1.
    def perm(j):
        return (j + n_ct - 1) % n_ct

    vmem_limit = int(min(max(need + (8 << 20), 32 << 20), int(0.95 * cap)))

    w_spec_kwargs = {}
    if n_ct == 1 and hasattr(pl, "Buffered"):
        # Constant index_map -> weights fully resident; a single buffer suffices.
        w_spec_kwargs["pipeline_mode"] = pl.Buffered(1)

    quot_p, num_p, den_p = pl.pallas_call(
        _make_godin_kernel(g_local, mxu_dtype),
        grid=(n_bt, n_ct),
        in_specs=[
            pl.BlockSpec((tb, F_pad), lambda i, j: (i, 0)),                 # x (resident over j)
            pl.BlockSpec((tn, F_pad), lambda i, j: (perm(j), 0),
                         **w_spec_kwargs),                                  # weight tile
            pl.BlockSpec(memory_space=pltpu.MemorySpace.SMEM),              # g shift scalar
        ],
        out_specs=(
            pl.BlockSpec((tb, tn), lambda i, j: (i, perm(j))),              # quotients
            pl.BlockSpec((tb, tn), lambda i, j: (i, perm(j))),              # numerators
            pl.BlockSpec((tb, 1), lambda i, j: (i, 0)),                     # denominators column
        ),
        out_shape=(
            jax.ShapeDtypeStruct((b_pad, c_aug), out_dtype),
            jax.ShapeDtypeStruct((b_pad, c_aug), out_dtype),
            jax.ShapeDtypeStruct((b_pad, 1), jnp.float32),
        ),
        scratch_shapes=[
            pltpu.VMEM((tb, 1), jnp.float32),      # exp(-pre)
            pltpu.VMEM((tb, 1), jnp.float32),      # 1 / (||x|| + 1e-4)
        ],
        compiler_params=pltpu.CompilerParams(
            dimension_semantics=("parallel", "arbitrary"),
            vmem_limit_bytes=vmem_limit),
    )(x_p, w_p, g_shift)

    return quot_p[:B, :C], num_p[:B, :C], den_p[:B, :1]


def godin_reference(x, h_w, g_w, g_b, bn_gamma, bn_beta, bn_mean, bn_var,
                    bn_eps=1e-5):
    pre = x @ g_w.T + g_b
    pre = (pre - bn_mean) / jnp.sqrt(bn_var + bn_eps) * bn_gamma + bn_beta
    den = jax.nn.sigmoid(pre)
    xn = x / (jnp.linalg.norm(x, axis=1, keepdims=True) + 1e-4)
    wn = h_w / (jnp.linalg.norm(h_w, axis=1, keepdims=True) + 1e-4)
    num = xn @ wn.T
    return num / den, num, den


if __name__ == "__main__":
    B, F, C = 8, 32, 10
    key = jax.random.PRNGKey(0)
    kx, kh, kgw, kgb = jax.random.split(key, 4)

    x = jax.random.normal(kx, (B, F), dtype=jnp.float32)

    # h.weight: kaiming_normal_(nonlinearity='relu') -> N(0, 2/fan_in)
    h_w = jax.random.normal(kh, (C, F), dtype=jnp.float32) * jnp.sqrt(2.0 / F)

    # g Linear(F, 1): default PyTorch init U(-1/sqrt(F), 1/sqrt(F))
    bound = 1.0 / jnp.sqrt(F)
    g_w = jax.random.uniform(kgw, (1, F), minval=-bound, maxval=bound,
                             dtype=jnp.float32)
    g_b = jax.random.uniform(kgb, (1,), minval=-bound, maxval=bound,
                             dtype=jnp.float32)

    # BatchNorm1d(1) params / running stats at init
    bn_gamma = jnp.ones((1,), jnp.float32)
    bn_beta = jnp.zeros((1,), jnp.float32)
    bn_mean = jnp.zeros((1,), jnp.float32)
    bn_var = jnp.ones((1,), jnp.float32)

    rq, rn, rd = godin_reference(x, h_w, g_w, g_b,
                                 bn_gamma, bn_beta, bn_mean, bn_var)

    # Exact-math validation: f32 MXU operands must match the reference tightly.
    quot, num, den = godin_forward(x, h_w, g_w, g_b,
                                   bn_gamma, bn_beta, bn_mean, bn_var,
                                   mxu_dtype=jnp.float32)
    jax.block_until_ready((quot, num, den))
    assert quot.shape == (B, C) and num.shape == (B, C) and den.shape == (B, 1)
    assert jnp.allclose(quot, rq, atol=1e-5, rtol=1e-5)
    assert jnp.allclose(num, rn, atol=1e-5, rtol=1e-5)
    assert jnp.allclose(den, rd, atol=1e-5, rtol=1e-5)

    # Performance path: bf16 MXU operands (default) -> relaxed tolerance.
    quot, num, den = godin_forward(x, h_w, g_w, g_b,
                                   bn_gamma, bn_beta, bn_mean, bn_var)
    jax.block_until_ready((quot, num, den))
    assert quot.shape == (B, C) and num.shape == (B, C) and den.shape == (B, 1)
    assert jnp.allclose(quot, rq, atol=3e-2, rtol=3e-2)
    assert jnp.allclose(num, rn, atol=3e-2, rtol=3e-2)
    assert jnp.allclose(den, rd, atol=3e-2, rtol=3e-2)

    print("KERNEL_OK")
</pallas_src>

<mosaic_0001>
module attributes {stable_mosaic.version = 11 : i64} {
  func.func @kernel(%arg0: i32, %arg1: i32, %arg2: memref<8x128xf32, #tpu.memory_space<vmem>>, %arg3: memref<128x128xf32, #tpu.memory_space<vmem>>, %arg4: memref<1x1xf32, #tpu.memory_space<smem>>, %arg5: memref<8x128xf32, #tpu.memory_space<vmem>>, %arg6: memref<8x128xf32, #tpu.memory_space<vmem>>, %arg7: memref<8x1xf32, #tpu.memory_space<vmem>>, %arg8: memref<8x1xf32, #tpu.memory_space<vmem>>, %arg9: memref<8x1xf32, #tpu.memory_space<vmem>>) attributes {dimension_semantics = [#tpu.dimension_semantics<parallel>, #tpu.dimension_semantics<arbitrary>], iteration_bounds = array<i64: 1, 1>, scalar_prefetch = 0 : i64, scratch_operands = 2 : i64, tpu.core_type = #tpu.core_type<tc>, window_params = [{transform_indices = @transform_0, window_bounds = array<i64: 8, 128>}, {pipeline_mode = #tpu.pipeline_mode<synchronous>, transform_indices = @transform_1, window_bounds = array<i64: 128, 128>}, {transform_indices = @transform_2, window_bounds = array<i64: 1, 1>}, {transform_indices = @transform_3, window_bounds = array<i64: 8, 128>}, {transform_indices = @transform_4, window_bounds = array<i64: 8, 128>}, {transform_indices = @transform_5, window_bounds = array<i64: 8, 1>}]} {
    %c0 = arith.constant 0 : index
    %c0_0 = arith.constant 0 : index
    %0 = vector.load %arg2[%c0, %c0_0] : memref<8x128xf32, #tpu.memory_space<vmem>>, vector<8x128xf32>
    %c0_1 = arith.constant 0 : index
    %c0_2 = arith.constant 0 : index
    %1 = vector.load %arg3[%c0_1, %c0_2] : memref<128x128xf32, #tpu.memory_space<vmem>>, vector<128x128xf32>
    %cst = arith.constant dense<0.000000e+00> : vector<8x128xf32>
    %2 = tpu.matmul %0, %1, %cst {dimension_numbers = #tpu.dot_dimension_numbers<[1], [1], [0], [0], [0, 0, 1, 0], [], []>} : vector<8x128xf32>, vector<128x128xf32>, vector<8x128xf32> -> vector<8x128xf32>
    %c0_i32 = arith.constant 0 : i32
    %3 = arith.cmpi eq, %arg1, %c0_i32 : i32
    %4 = arith.extui %3 : i1 to i32
    %c0_i32_3 = arith.constant 0 : i32
    %5 = arith.cmpi ne, %4, %c0_i32_3 : i32
    scf.if %5 {
      %16 = arith.mulf %0, %0 : vector<8x128xf32>
      %cst_13 = arith.constant dense<0.000000e+00> : vector<8xf32>
      %17 = vector.multi_reduction <add>, %16, %cst_13 [1] : vector<8x128xf32> to vector<8xf32>
      %18 = vector.shape_cast %17 : vector<8xf32> to vector<8x1xf32>
      %19 = math.sqrt %18 : vector<8x1xf32>
      %cst_14 = arith.constant 9.99999974E-5 : f32
      %20 = vector.broadcast %cst_14 : f32 to vector<8x1xf32>
      %21 = arith.addf %19, %20 : vector<8x1xf32>
      %22 = tpu.reciprocal %21 : vector<8x1xf32> -> vector<8x1xf32>
      %c0_15 = arith.constant 0 : index
      %c0_16 = arith.constant 0 : index
      %23 = vector.load %arg9[%c0_15, %c0_16] : memref<8x1xf32, #tpu.memory_space<vmem>>, vector<8x1xf32>
      tpu.vector_store %arg9[%c0_15, %c0_16], %22 {strides = array<i32>} : memref<8x1xf32, #tpu.memory_space<vmem>>, vector<8x1xf32>,
      %24 = vector.extract_strided_slice %2 {offsets = [0, 10], sizes = [8, 1], strides = [1, 1]} : vector<8x128xf32> to vector<8x1xf32>
      %c0_17 = arith.constant 0 : index
      %c0_18 = arith.constant 0 : index
      %25 = memref.load %arg4[%c0_17, %c0_18] : memref<1x1xf32, #tpu.memory_space<smem>>
      %26 = vector.broadcast %25 : f32 to vector<8x1xf32>
      %27 = arith.addf %24, %26 : vector<8x1xf32>
      %cst_19 = arith.constant 0.000000e+00 : f32
      %28 = vector.broadcast %cst_19 : f32 to vector<8x1xf32>
      %29 = arith.subf %28, %27 : vector<8x1xf32>
      %30 = math.exp %29 : vector<8x1xf32>
      %c0_20 = arith.constant 0 : index
      %c0_21 = arith.constant 0 : index
      %31 = vector.load %arg8[%c0_20, %c0_21] : memref<8x1xf32, #tpu.memory_space<vmem>>, vector<8x1xf32>
      tpu.vector_store %arg8[%c0_20, %c0_21], %30 {strides = array<i32>} : memref<8x1xf32, #tpu.memory_space<vmem>>, vector<8x1xf32>,
      %cst_22 = arith.constant 1.000000e+00 : f32
      %32 = vector.broadcast %cst_22 : f32 to vector<8x1xf32>
      %33 = arith.addf %32, %30 : vector<8x1xf32>
      %34 = tpu.reciprocal %33 : vector<8x1xf32> -> vector<8x1xf32>
      %c0_23 = arith.constant 0 : index
      %c0_24 = arith.constant 0 : index
      %35 = vector.load %arg7[%c0_23, %c0_24] : memref<8x1xf32, #tpu.memory_space<vmem>>, vector<8x1xf32>
      tpu.vector_store %arg7[%c0_23, %c0_24], %34 {strides = array<i32>} : memref<8x1xf32, #tpu.memory_space<vmem>>, vector<8x1xf32>,
    } else {
    }
    %c0_4 = arith.constant 0 : index
    %c0_5 = arith.constant 0 : index
    %6 = vector.load %arg9[%c0_4, %c0_5] : memref<8x1xf32, #tpu.memory_space<vmem>>, vector<8x1xf32>
    %7 = vector.broadcast %6 : vector<8x1xf32> to vector<8x128xf32>
    %8 = arith.mulf %2, %7 : vector<8x128xf32>
    %c0_6 = arith.constant 0 : index
    %c0_7 = arith.constant 0 : index
    %9 = vector.load %arg8[%c0_6, %c0_7] : memref<8x1xf32, #tpu.memory_space<vmem>>, vector<8x1xf32>
    %cst_8 = arith.constant 1.000000e+00 : f32
    %10 = vector.broadcast %cst_8 : f32 to vector<8x1xf32>
    %11 = arith.addf %10, %9 : vector<8x1xf32>
    %12 = vector.broadcast %11 : vector<8x1xf32> to vector<8x128xf32>
    %13 = arith.mulf %8, %12 : vector<8x128xf32>
    %c0_9 = arith.constant 0 : index
    %c0_10 = arith.constant 0 : index
    %14 = vector.load %arg6[%c0_9, %c0_10] : memref<8x128xf32, #tpu.memory_space<vmem>>, vector<8x128xf32>
    tpu.vector_store %arg6[%c0_9, %c0_10], %8 {strides = array<i32>} : memref<8x128xf32, #tpu.memory_space<vmem>>, vector<8x128xf32>,
    %c0_11 = arith.constant 0 : index
    %c0_12 = arith.constant 0 : index
    %15 = vector.load %arg5[%c0_11, %c0_12] : memref<8x128xf32, #tpu.memory_space<vmem>>, vector<8x128xf32>
    tpu.vector_store %arg5[%c0_11, %c0_12], %13 {strides = array<i32>} : memref<8x128xf32, #tpu.memory_space<vmem>>, vector<8x128xf32>,
    return
  }
  func.func @transform_0(%arg0: i32, %arg1: i32) -> (i32, i32) {
    %c0_i32 = arith.constant 0 : i32
    %c0_i32_0 = arith.constant 0 : i32
    return %arg0, %c0_i32 : i32, i32
  }
  func.func @transform_1(%arg0: i32, %arg1: i32) -> (i32, i32) {
    %c1_i32 = arith.constant 1 : i32
    %0 = arith.addi %arg1, %c1_i32 : i32
    %c1_i32_0 = arith.constant 1 : i32
    %1 = arith.subi %0, %c1_i32_0 : i32
    %c1_i32_1 = arith.constant 1 : i32
    %c0_i32 = arith.constant 0 : i32
    %2 = arith.cmpi eq, %c1_i32_1, %c0_i32 : i32
    %c1_i32_2 = arith.constant 1 : i32
    %3 = arith.select %2, %c1_i32_2, %c1_i32_1 : i32
    %4 = arith.remsi %1, %3 : i32
    %c0_i32_3 = arith.constant 0 : i32
    %5 = arith.cmpi ne, %4, %c0_i32_3 : i32
    %c0_i32_4 = arith.constant 0 : i32
    %6 = arith.cmpi slt, %4, %c0_i32_4 : i32
    %c0_i32_5 = arith.constant 0 : i32
    %7 = arith.cmpi slt, %3, %c0_i32_5 : i32
    %8 = arith.xori %6, %7 : i1
    %9 = arith.andi %8, %5 : i1
    %10 = arith.addi %4, %3 : i32
    %11 = arith.select %9, %10, %4 : i32
    %c0_i32_6 = arith.constant 0 : i32
    %c0_i32_7 = arith.constant 0 : i32
    return %11, %c0_i32_6 : i32, i32
  }
  func.func @transform_2(%arg0: i32, %arg1: i32) -> (i32, i32) {
    %c0_i32 = arith.constant 0 : i32
    %c0_i32_0 = arith.constant 0 : i32
    %c0_i32_1 = arith.constant 0 : i32
    return %c0_i32, %c0_i32_0 : i32, i32
  }
  func.func @transform_3(%arg0: i32, %arg1: i32) -> (i32, i32) {
    %c1_i32 = arith.constant 1 : i32
    %0 = arith.addi %arg1, %c1_i32 : i32
    %c1_i32_0 = arith.constant 1 : i32
    %1 = arith.subi %0, %c1_i32_0 : i32
    %c1_i32_1 = arith.constant 1 : i32
    %c0_i32 = arith.constant 0 : i32
    %2 = arith.cmpi eq, %c1_i32_1, %c0_i32 : i32
    %c1_i32_2 = arith.constant 1 : i32
    %3 = arith.select %2, %c1_i32_2, %c1_i32_1 : i32
    %4 = arith.remsi %1, %3 : i32
    %c0_i32_3 = arith.constant 0 : i32
    %5 = arith.cmpi ne, %4, %c0_i32_3 : i32
    %c0_i32_4 = arith.constant 0 : i32
    %6 = arith.cmpi slt, %4, %c0_i32_4 : i32
    %c0_i32_5 = arith.constant 0 : i32
    %7 = arith.cmpi slt, %3, %c0_i32_5 : i32
    %8 = arith.xori %6, %7 : i1
    %9 = arith.andi %8, %5 : i1
    %10 = arith.addi %4, %3 : i32
    %11 = arith.select %9, %10, %4 : i32
    %c0_i32_6 = arith.constant 0 : i32
    return %arg0, %11 : i32, i32
  }
  func.func @transform_4(%arg0: i32, %arg1: i32) -> (i32, i32) {
    %c1_i32 = arith.constant 1 : i32
    %0 = arith.addi %arg1, %c1_i32 : i32
    %c1_i32_0 = arith.constant 1 : i32
    %1 = arith.subi %0, %c1_i32_0 : i32
    %c1_i32_1 = arith.constant 1 : i32
    %c0_i32 = arith.constant 0 : i32
    %2 = arith.cmpi eq, %c1_i32_1, %c0_i32 : i32
    %c1_i32_2 = arith.constant 1 : i32
    %3 = arith.select %2, %c1_i32_2, %c1_i32_1 : i32
    %4 = arith.remsi %1, %3 : i32
    %c0_i32_3 = arith.constant 0 : i32
    %5 = arith.cmpi ne, %4, %c0_i32_3 : i32
    %c0_i32_4 = arith.constant 0 : i32
    %6 = arith.cmpi slt, %4, %c0_i32_4 : i32
    %c0_i32_5 = arith.constant 0 : i32
    %7 = arith.cmpi slt, %3, %c0_i32_5 : i32
    %8 = arith.xori %6, %7 : i1
    %9 = arith.andi %8, %5 : i1
    %10 = arith.addi %4, %3 : i32
    %11 = arith.select %9, %10, %4 : i32
    %c0_i32_6 = arith.constant 0 : i32
    return %arg0, %11 : i32, i32
  }
  func.func @transform_5(%arg0: i32, %arg1: i32) -> (i32, i32) {
    %c0_i32 = arith.constant 0 : i32
    %c0_i32_0 = arith.constant 0 : i32
    return %arg0, %c0_i32 : i32, i32
  }
}

</mosaic_0001>

<bundles_post_ra>
// kernel: godin_forward.1
= control target key start
LH: loop header
LB: loop body
LE: loop exit
PB: predicated region body
PF: predicated region fallthrough
CT: control target
= control target key end

     0   :  { %12 = vsyncpa [#allocation6], 0  ;;  %v333_v3 = vmov 0.0|0.0   ;;  %vm334_vm0 = vmmov 0   ;;  %v335_v6 = vmov 0.0   ;;  %s454_s0 = inlined_call_operand.vmem [shape: f32[8,128], index: 0, kind: input, shape index: {}]   ;;  %s455_s1 = inlined_call_operand.vmem [shape: f32[128,128], index: 1, kind: input, shape index: {}]   ;;  %s456_s2 = inlined_call_operand.<no memory space> [shape: f32[1,1], index: 2, kind: input, shape index: {}]   ;;  %s457_s3 = inlined_call_operand.hbm [shape: f32[8,128], index: 3, kind: output, shape index: {0}]   ;;  %s458_s4 = inlined_call_operand.hbm [shape: f32[8,128], index: 4, kind: output, shape index: {1}]   ;;  %s459_s5 = inlined_call_operand.vmem [shape: f32[8,1], index: 5, kind: output, shape index: {2}]  }
   0x1   :  { %v21_v0 = vld [vmem:[%s455_s1] sm:$0xff]  ;;  %v22_v1 = vld [vmem:[%s455_s1 + $0x8] sm:$0xff]  ;;  %244 = vmatprep.subr.bf16.mxu0 %v333_v3  ;;  %241 = vmatprep.mubr.msk.f32.mxu0 %vm334_vm0, %v335_v6  ;;  %v23_v7 = vld [vmem:[%s455_s1 + $0x10] sm:$0xff] }
   0x2   :  { %v20_v2 = vld [vmem:[%s454_s0] sm:$0xff]  ;;  %v245_v4 = vpack.c.bf16 %v22_v1, %v21_v0  ;;  %v24_v8 = vld [vmem:[%s455_s1 + $0x18] sm:$0xff] }
   0x3   :  { %v111_v5 = vmul.f32 %v20_v2, %v20_v2 }
   0x4   :  { %246 = vmatpush3.bf16.xpose.msra.mxu0 %v245_v4 }
   0x5   :  { %112 = vadd.xlane.f32.xlu0 %v111_v5  ;;  %247 = vmatprep.subr.bf16.mxu0 %v333_v3 }
   0x6   :  { %13 = vsyncpa [#allocation8], 0  ;;  %v248_v9 = vpack.c.bf16 %v24_v8, %v23_v7  ;;  %v25_v10 = vld [vmem:[%s455_s1 + $0x20] sm:$0xff]  ;;  %v26_v11 = vld [vmem:[%s455_s1 + $0x28] sm:$0xff]  ;;  %v336_v24 = vmov 0   ;;  %vm123_vm3 = vcmask 7168   ;;  %v126_v38 = vstv %s456_s2 }
   0x7   :  { %v251_v12 = vpack.c.bf16 %v26_v11, %v25_v10  ;;  %v27_v13 = vld [vmem:[%s455_s1 + $0x30] sm:$0xff]  ;;  %v28_v14 = vld [vmem:[%s455_s1 + $0x38] sm:$0xff]  ;;  %v29_v16 = vld [vmem:[%s455_s1 + $0x40] sm:$0xff]  ;;  %275 = vset.pattern.permute.xlu1 %v336_v24  ;;  %276 = vset.pattern.permute.xlu0 %v336_v24  ;;  %s337_s27 = smov 118   ;;  %s338_s2 = smov [#allocation7]  }
   0x8   :  { %v254_v15 = vpack.c.bf16 %v28_v14, %v27_v13  ;;  %v30_v17 = vld [vmem:[%s455_s1 + $0x48] sm:$0xff]  ;;  %v31_v19 = vld [vmem:[%s455_s1 + $0x50] sm:$0xff]  ;;  %v32_v20 = vld [vmem:[%s455_s1 + $0x58] sm:$0xff]  ;;  %s176_s0 = sshll.u32 %s338_s2, 4  ;;  %s177_s0 = int_to_ptr.vmem [resolvable:$true] %s176_s0 }
   0x9   :  { %v257_v18 = vpack.c.bf16 %v30_v17, %v29_v16  ;;  %v260_v21 = vpack.c.bf16 %v32_v20, %v31_v19  ;;  %v33_v22 = vld [vmem:[%s455_s1 + $0x60] sm:$0xff]  ;;  %v34_v23 = vld [vmem:[%s455_s1 + $0x68] sm:$0xff]  ;;  %v35_v26 = vld [vmem:[%s455_s1 + $0x70] sm:$0xff]  ;;  %s285_s28 = scalar_lea.vmem %s177_s0, 128  ;;  %p290_p1 = scmp.lt.s32.totalorder %s177_s0, %s177_s0 }
   0xa   :  { %v263_v25 = vpack.c.bf16 %v34_v23, %v33_v22  ;;  %v36_v27 = vld [vmem:[%s455_s1 + $0x78] sm:$0xff]  ;;  %p286_p0 = scmp.ne.s32.totalorder %s177_s0, %s285_s28  ;;  %p291_p2 = scmp.lt.s32.totalorder %s285_s28, %s285_s28 }
   0xb   :  { %v266_v28 = vpack.c.bf16 %v36_v27, %v35_v26 }
   0xc   :  { %249 = vmatpush3.bf16.xpose.msra.mxu0 %v248_v9  ;;  %p292_p3 = por %p291_p2, %p290_p1 }
   0xd   :  { %250 = vmatprep.subr.bf16.mxu0 %v333_v3 }
   0xe   :  { %p293_p4 = pnand %p292_p3, %p286_p0 }
  0x14   :  { %252 = vmatpush3.bf16.xpose.msra.mxu0 %v251_v12 }
  0x15   :  { %253 = vmatprep.subr.bf16.mxu0 %v333_v3 }
  0x1c   :  { %255 = vmatpush3.bf16.xpose.msra.mxu0 %v254_v15 }
  0x1d   :  { %256 = vmatprep.subr.bf16.mxu0 %v333_v3 }
  0x24   :  { %258 = vmatpush3.bf16.xpose.msra.mxu0 %v257_v18 }
  0x25   :  { %259 = vmatprep.subr.bf16.mxu0 %v333_v3 }
  0x2c   :  { %261 = vmatpush3.bf16.xpose.msra.mxu0 %v260_v21 }
  0x2d   :  { %262 = vmatprep.subr.bf16.mxu0 %v333_v3 }
  0x34   :  { %264 = vmatpush3.bf16.xpose.msra.mxu0 %v263_v25 }
  0x35   :  { %265 = vmatprep.subr.bf16.mxu0 %v333_v3 }
  0x3c   :  { %267 = vmatpush3.bf16.xpose.msra.mxu0 %v266_v28 }
  0x43   :  { %242 = vmatmul.mubr.f32.vlgmr.msra.gmra.mrb[0].mxu0 %v20_v2 }
  0x92   :  { %v113_v29 = vpop.xlane.xlu0 %112 }
  0x93   :  { %277 = vrsqrt.f32 %v113_v29  ;;  %vm116_vm1 = vcmp.eq.f32.partialorder %v113_v29, inf  ;;  %v119_v31 = vand.u32 2147483648, %v113_v29  ;;  %vm118_vm2 = vcmp.eq.f32.partialorder %v113_v29, 0.0 }
  0x9d   :  { %v278_v30 = vpop.eup %277 }
  0x9e   :  { %v115_v32 = vmul.f32 %v278_v30, %v113_v29 }
  0xa0   :  { %v117_v33 = vsel %vm116_vm1, %v113_v29, %v115_v32 }
  0xa1   :  { %v120_v34 = vsel %vm118_vm2, %v119_v31, %v117_v33 }
  0xa2   :  { %v121_v35 = vadd.f32 0.0001, %v120_v34 }
  0xa4   :  { %279 = vrcp.f32 %v121_v35 }
  0xae   :  { %v280_v36 = vpop.eup %279 }
  0xaf   :  { %124 = vst.msk [vmem:[#allocation3] sm:$0xff] %vm123_vm3, %v280_v36 }
  0xb6   :  { %v143_v37 = vld [vmem:[#allocation3] sm:$0xff] }
  0xb7   :  { %146 = vperm.xlu1 %275, %v143_v37  }
 0x116   :  { %v103_v39 = vpop.f32.mrb[0].mxu0 }
 0x117   :  { %v127_v40 = vadd.f32 %v126_v38, %v103_v39  ;;  %v243_v41 = vpop.f32.mrb[1].mxu0 }
 0x119   :  { %v128_v42 = vsub.f32 0.0, %v127_v40 }
 0x11b   :  { %v129_v43 = vmul.f32 1.442695, %v128_v42 }
 0x11d   :  { %281 = vpow2.f32 %v129_v43 }
 0x127   :  { %v282_v44 = vpop.eup %281 }
 0x128   :  { %132 = vrot.lane.b32.xlu0 %v282_v44, %s337_s27  ;;  %v136_v47 = vadd.f32 1.0, %v282_v44 }
 0x12a   :  { %283 = vrcp.f32 %v136_v47 }
 0x134   :  { %v284_v51 = vpop.eup %283 }
 0x136   :  { %v147_v45 = vpop.permute.xlu1 %146 }
 0x137   :  { %v149_v46 = vmul.f32 %v147_v45, %v103_v39 }
 0x139   :  { %158 = vst [vmem:[#allocation7] sm:$0xff] %v149_v46 }
 0x19a   :  { %v133_v48 = vpop.permute.xlu0 %132 }
 0x19b   :  { %135 = vst.msk [vmem:[#allocation2] sm:$0xff] %vm123_vm3, %v133_v48 }
 0x1a2   :  { %v150_v49 = vld [vmem:[#allocation2] sm:$0xff] }
 0x1a3   :  { %v151_v50 = vadd.f32 1.0, %v150_v49 }
 0x1a5   :  { %154 = vperm.xlu1 %275, %v151_v50  }
 0x1a9   :  { %139 = vrot.lane.b32.xlu1 %v284_v51, %s337_s27 }
 0x1aa   :  { %296 = shalt.err (!%p293_p4)
}
 0x1ab   :  { %s297_s6 = scalar_lea.hbm %s458_s4, 128 }
 0x1ac   :  { %p298_p5 = scmp.ne.s32.totalorder %s458_s4, %s297_s6  ;;  %p301_p6 = scmp.lt.u32.totalorder %s297_s6, %s458_s4 }
 0x1ae   :  { %p303_p7 = pnand %p301_p6, %p298_p5 }
 0x1b0   :  { %306 = shalt.err (!%p303_p7)
}
 0x1b1   :  { %179 = dma.vmem_to_hbm [thread:$0]  %s177_s0, 128, %s458_s4, [#allocation8]  }
 0x1b2   :  { %s339_s13 = smov [#allocation5]  }
 0x1b3   :  { %s166_s14 = sshll.u32 %s339_s13, 4  ;;  %s167_s14 = int_to_ptr.vmem [resolvable:$true] %s166_s14 }
 0x1b4   :  { %s307_s15 = scalar_lea.vmem %s167_s14, 128  ;;  %p312_p9 = scmp.lt.s32.totalorder %s167_s14, %s167_s14 }
 0x1b5   :  { %p308_p8 = scmp.ne.s32.totalorder %s167_s14, %s307_s15  ;;  %p313_p10 = scmp.lt.s32.totalorder %s307_s15, %s307_s15 }
 0x1b7   :  { %p314_p11 = por %p313_p10, %p312_p9 }
 0x1b9   :  { %p315_p12 = pnand %p314_p11, %p308_p8 }
 0x224   :  { %v155_v52 = vpop.permute.xlu1 %154 }
 0x225   :  { %v157_v53 = vmul.f32 %v155_v52, %v149_v46 }
 0x227   :  { %159 = vst [vmem:[#allocation5] sm:$0xff] %v157_v53 }
 0x228   :  { %v140_v54 = vpop.permute.xlu1 %139 }
 0x229   :  { %318 = shalt.err (!%p315_p12)
}
 0x22a   :  { %s319_s18 = scalar_lea.hbm %s457_s3, 128 }
 0x22b   :  { %p320_p13 = scmp.ne.s32.totalorder %s457_s3, %s319_s18  ;;  %p323_p0 = scmp.lt.u32.totalorder %s319_s18, %s457_s3 }
 0x22d   :  { %p325_p1 = pnand %p323_p0, %p320_p13 }
 0x22f   :  { %328 = shalt.err (!%p325_p1)
}
 0x230   :  { %169 = dma.vmem_to_hbm [thread:$0]  %s167_s14, 128, %s457_s3, [#allocation6]   ;;  %142 = vst.msk [vmem:[%s459_s5] sm:$0xff] %vm123_vm3, %v140_v54 }
 0x231   :  { %329 = dma.done.wait [#allocation6], 128  }
 0x232   :  { %330 = vsyncadd [#allocation6], 4294967168 }
 0x233   :  { %331 = dma.done.wait [#allocation8], 128  }
 0x234   :  { %332 = vsyncadd [#allocation8], 4294967168 }
 0x235   :  { %190 = vsyncpa [#allocation6], 1 }
 0x236   :  { %191 = vsyncpa [#allocation8], 1 }

</bundles_post_ra>
